<compile_context>
chip_gen: v7x
topology: tpu7x:2x2x1
jax: 0.10.0
libtpu: 0.0.40
codegen_flags: <defaults>
</compile_context>

<pallas_src>
from functools import partial

import jax
import jax.numpy as jnp
from jax.experimental import pallas as pl
from jax.experimental.pallas import tpu as pltpu


def _convblock_kernel(x_ref, w1_ref, b1_ref, w2_ref, b2_ref, o_ref, *, H, W, Cout):
    """One grid step = NB images flattened to an (M = NB*H, lanes) row slab.

    x_ref  : (M, W*Cin)         bf16 lane-dense NHWC rows (unpadded)
    w1_ref : (W*Cin,  3*W*Cout) bf16 pad-free stacked width-Toeplitz conv1 weights
    b1_ref : (1, W*Cout)        f32 folded conv-bias + BN bias (tiled over W)
    w2_ref : (W*Cout, 3*W*Cout) bf16 pad-free stacked width-Toeplitz conv2 weights
    b2_ref : (1, W*Cout)        f32
    o_ref  : (M, W*Cout)        f32 lane-dense output rows
    """
    f32 = jnp.float32
    M = x_ref.shape[0]
    WCout = W * Cout

    # Per-image row masks for the +-1-row halo adds (built once, reused by both
    # convs): the top / bottom row of each image must not receive a contribution
    # rolled in from the neighbouring image (or from the circular wraparound).
    row = jax.lax.broadcasted_iota(jnp.int32, (M, WCout), 0)
    not_top = (row % H) != 0
    not_bot = (row % H) != (H - 1)

    def conv3x3_bias_relu(y_bf16, w_ref, b_ref):
        # One MXU matmul per conv: (M, K) @ (K, 3*W*Cout).  The three aligned
        # 128-lane column blocks hold the ky=0/1/2 kernel-row contributions for
        # every lane-dense output (x, co) of each row.
        p = jnp.dot(y_bf16, w_ref[...], preferred_element_type=f32)   # (M, 3*WCout)
        p_k0 = p[:, 0 * WCout:1 * WCout]   # uses input row y-1
        p_k1 = p[:, 1 * WCout:2 * WCout]   # uses input row y
        p_k2 = p[:, 2 * WCout:3 * WCout]   # uses input row y+1

        # Height halo: XLU sublane rolls + row masks (no zero-row concatenates,
        # no shifted VMEM copies).  roll(x, s)[r] == x[(r - s) % M] (jnp.roll).
        acc = p_k1
        acc = acc + jnp.where(not_top, pltpu.roll(p_k0, 1, axis=0), 0.0)
        acc = acc + jnp.where(not_bot, pltpu.roll(p_k2, M - 1, axis=0), 0.0)

        # Folded BN bias + ReLU, kept in f32 (v5e VPU has no bf16 ALU).
        # Dropout2d is the identity in eval mode.
        return jnp.maximum(acc + b_ref[...], 0.0)

    y1 = conv3x3_bias_relu(x_ref[...], w1_ref, b1_ref)                 # (M, WCout) f32
    y2 = conv3x3_bias_relu(y1.astype(jnp.bfloat16), w2_ref, b2_ref)    # (M, WCout) f32
    o_ref[...] = y2.astype(o_ref.dtype)


def _build_conv_matrix(w_eff, W):
    """(Cout, C, 3, 3) conv weights -> (W*C, 3*W*Cout) pad-free stacked Toeplitz.

    M[xi*C + ci, ky*W*Cout + xo*Cout + co] = w_eff[co, ci, ky, xi - xo + 1]
      when 0 <= xi - xo + 1 <= 2, else 0,
    so (lane-dense UNPADDED image row) @ M yields, per ky, the ky-th kernel-row
    contribution to every lane-dense output (xo, co) of that row; width zero
    padding is implicit (out-of-range taps simply have no matrix entry).
    """
    Cout, C = w_eff.shape[0], w_eff.shape[1]
    K = W * C
    Ncol = 3 * W * Cout

    k = jnp.arange(K)
    xi = k // C
    ci = k % C
    n = jnp.arange(Ncol)
    ky = n // (W * Cout)
    xo = (n // Cout) % W
    co = n % Cout

    kx = xi[:, None] - xo[None, :] + 1                    # (K, Ncol) kernel-col index
    valid = (kx >= 0) & (kx <= 2)
    vals = w_eff[co[None, :], ci[:, None], ky[None, :], jnp.clip(kx, 0, 2)]
    return jnp.where(valid, vals, 0.0)


def _pick_images_per_step(N, H, target_rows=256):
    """Images per grid step: push M = NB*H toward the MXU depth (~256) while
    keeping >= 2 grid steps when possible so both v7x TensorCores get work
    (costs nothing on single-TC v5e/v6e)."""
    divisors = [d for d in range(1, N + 1) if N % d == 0]
    cands = [d for d in divisors if d * H <= target_rows and N // d >= 2]
    if not cands:
        cands = [d for d in divisors if d * H <= target_rows] or [1]
    return max(cands)


def conv_block_forward(x_nchw, params):
    """Fused ConvBlock forward. Input/output in PyTorch NCHW layout."""
    (w1, b1, g1, be1, rm1, rv1,
     w2, b2, g2, be2, rm2, rv2) = params
    eps = 1e-5

    Cout, Cin, _, _ = w1.shape
    N, _, H, W = x_nchw.shape
    WCin = W * Cin
    WCout = W * Cout
    # Note: W*Cout a multiple of 128 keeps all lane slices / stores full-width;
    # other shapes remain correct but fall back to masked partial stores.

    # Single NCHW -> lane-dense (N*H, W*Cin) relayout, cast once to bf16 (the
    # MXU operand dtype) so the kernel input HBM traffic is halved.
    x = (jnp.transpose(x_nchw, (0, 2, 3, 1))
         .reshape(N * H, WCin)
         .astype(jnp.bfloat16))

    # Fold BatchNorm (eval) scale into the conv weights; only bias+ReLU stay
    # in-kernel.
    s1 = g1 / jnp.sqrt(rv1 + eps)
    s2 = g2 / jnp.sqrt(rv2 + eps)
    w1_eff = w1 * s1[:, None, None, None]
    w2_eff = w2 * s2[:, None, None, None]
    bias1 = be1 + (b1 - rm1) * s1
    bias2 = be2 + (b2 - rm2) * s2

    # Pad-free stacked Toeplitz weight matrices (bf16 MXU operands) and
    # lane-dense biases.
    w1_big = _build_conv_matrix(w1_eff, W).astype(jnp.bfloat16)   # (W*Cin,  3*W*Cout)
    w2_big = _build_conv_matrix(w2_eff, W).astype(jnp.bfloat16)   # (W*Cout, 3*W*Cout)
    b1_row = jnp.tile(bias1, W)[None, :].astype(jnp.float32)      # (1, W*Cout)
    b2_row = jnp.tile(bias2, W)[None, :].astype(jnp.float32)

    NB = _pick_images_per_step(N, H)
    M = NB * H
    grid = (N // NB,)

    # Explicit VMEM budget: double-buffered activation in/out tiles + resident
    # weights/biases (+1 MiB headroom), floored at the default 16 MiB.
    act_bytes = 2 * (M * WCin * 2 + M * WCout * 4)
    w_bytes = w1_big.size * 2 + w2_big.size * 2 + (b1_row.size + b2_row.size) * 4
    vmem_limit = int(max(act_bytes + w_bytes + (1 << 20), 16 << 20))

    kernel = partial(_convblock_kernel, H=H, W=W, Cout=Cout)

    out = pl.pallas_call(
        kernel,
        out_shape=jax.ShapeDtypeStruct((N * H, WCout), jnp.float32),
        grid_spec=pltpu.PrefetchScalarGridSpec(
            num_scalar_prefetch=0,
            grid=grid,
            in_specs=[
                pl.BlockSpec((M, WCin), lambda n: (n, 0)),
                pl.BlockSpec((WCin, 3 * WCout), lambda n: (0, 0)),
                pl.BlockSpec((1, WCout), lambda n: (0, 0)),
                pl.BlockSpec((WCout, 3 * WCout), lambda n: (0, 0)),
                pl.BlockSpec((1, WCout), lambda n: (0, 0)),
            ],
            out_specs=pl.BlockSpec((M, WCout), lambda n: (n, 0)),
        ),
        compiler_params=pltpu.CompilerParams(
            dimension_semantics=("parallel",),
            vmem_limit_bytes=vmem_limit),
    )(x, w1_big, b1_row, w2_big, b2_row)

    # lane-dense (N*H, W*Cout) -> NCHW
    return jnp.transpose(out.reshape(N, H, W, Cout), (0, 3, 1, 2))


def _reference_forward(x_nchw, params):
    """Pure-JAX reference (lax conv, f32) for correctness checking."""
    (w1, b1, g1, be1, rm1, rv1,
     w2, b2, g2, be2, rm2, rv2) = params
    eps = 1e-5

    def conv_bn_relu(x, w, b, g, be, rm, rv):
        y = jax.lax.conv_general_dilated(
            x, w, window_strides=(1, 1), padding="SAME",
            dimension_numbers=("NCHW", "OIHW", "NCHW"))
        y = y + b[None, :, None, None]
        y = g[None, :, None, None] * (y - rm[None, :, None, None]) \
            / jnp.sqrt(rv[None, :, None, None] + eps) + be[None, :, None, None]
        return jnp.maximum(y, 0.0)

    x = x_nchw.astype(jnp.float32)
    x = conv_bn_relu(x, w1, b1, g1, be1, rm1, rv1)
    x = conv_bn_relu(x, w2, b2, g2, be2, rm2, rv2)
    return x


def _init_params(key, in_channels, out_channels):
    ks = jax.random.split(key, 8)
    w1 = 0.1 * jax.random.normal(ks[0], (out_channels, in_channels, 3, 3), jnp.float32)
    b1 = 0.1 * jax.random.normal(ks[1], (out_channels,), jnp.float32)
    g1 = 1.0 + 0.1 * jax.random.normal(ks[2], (out_channels,), jnp.float32)
    be1 = 0.1 * jax.random.normal(ks[3], (out_channels,), jnp.float32)
    rm1 = jnp.zeros((out_channels,), jnp.float32)
    rv1 = jnp.ones((out_channels,), jnp.float32)
    w2 = 0.1 * jax.random.normal(ks[4], (out_channels, out_channels, 3, 3), jnp.float32)
    b2 = 0.1 * jax.random.normal(ks[5], (out_channels,), jnp.float32)
    g2 = 1.0 + 0.1 * jax.random.normal(ks[6], (out_channels,), jnp.float32)
    be2 = 0.1 * jax.random.normal(ks[7], (out_channels,), jnp.float32)
    rm2 = jnp.zeros((out_channels,), jnp.float32)
    rv2 = jnp.ones((out_channels,), jnp.float32)
    return (w1, b1, g1, be1, rm1, rv1, w2, b2, g2, be2, rm2, rv2)


if __name__ == "__main__":
    key = jax.random.PRNGKey(0)
    k_x, k_p = jax.random.split(key)

    N, Cin, H, W = 2, 4, 16, 16
    Cout = 8

    x = jax.random.normal(k_x, (N, Cin, H, W), jnp.float32)
    params = _init_params(k_p, Cin, Cout)

    out = jax.block_until_ready(conv_block_forward(x, params))
    ref = jax.block_until_ready(_reference_forward(x, params))

    assert out.shape == (N, Cout, H, W), out.shape
    max_err = float(jnp.max(jnp.abs(out - ref)))
    # bf16 matmul operands (f32 accumulation) => loosened tolerance vs pure f32.
    assert jnp.allclose(out, ref, atol=5e-2, rtol=2e-2), max_err

    print("KERNEL_OK")
</pallas_src>

<mosaic_0001>
module attributes {stable_mosaic.version = 11 : i64} {
  func.func @_convblock_kernel(%arg0: i32, %arg1: memref<16x64xbf16, #tpu.memory_space<vmem>>, %arg2: memref<64x384xbf16, #tpu.memory_space<vmem>>, %arg3: memref<1x128xf32, #tpu.memory_space<vmem>>, %arg4: memref<128x384xbf16, #tpu.memory_space<vmem>>, %arg5: memref<1x128xf32, #tpu.memory_space<vmem>>, %arg6: memref<16x128xf32, #tpu.memory_space<vmem>>) attributes {dimension_semantics = [#tpu.dimension_semantics<parallel>], iteration_bounds = array<i64: 2>, scalar_prefetch = 0 : i64, scratch_operands = 0 : i64, tpu.core_type = #tpu.core_type<tc>, window_params = [{transform_indices = @transform_0, window_bounds = array<i64: 16, 64>}, {pipeline_mode = #tpu.pipeline_mode<synchronous>, transform_indices = @transform_1, window_bounds = array<i64: 64, 384>}, {pipeline_mode = #tpu.pipeline_mode<synchronous>, transform_indices = @transform_2, window_bounds = array<i64: 1, 128>}, {pipeline_mode = #tpu.pipeline_mode<synchronous>, transform_indices = @transform_3, window_bounds = array<i64: 128, 384>}, {pipeline_mode = #tpu.pipeline_mode<synchronous>, transform_indices = @transform_4, window_bounds = array<i64: 1, 128>}, {transform_indices = @transform_5, window_bounds = array<i64: 16, 128>}]} {
    %0 = tpu.iota {dimensions = array<i32: 0>} : vector<16x128xi32>
    %c16_i32 = arith.constant 16 : i32
    %c0_i32 = arith.constant 0 : i32
    %1 = arith.cmpi eq, %c16_i32, %c0_i32 : i32
    %c1_i32 = arith.constant 1 : i32
    %2 = arith.select %1, %c1_i32, %c16_i32 : i32
    %3 = vector.broadcast %2 : i32 to vector<16x128xi32>
    %4 = arith.remsi %0, %3 : vector<16x128xi32>
    %c0_i32_0 = arith.constant 0 : i32
    %5 = vector.broadcast %c0_i32_0 : i32 to vector<16x128xi32>
    %6 = arith.cmpi ne, %4, %5 : vector<16x128xi32>
    %c0_i32_1 = arith.constant 0 : i32
    %7 = vector.broadcast %c0_i32_1 : i32 to vector<16x128xi32>
    %8 = arith.cmpi slt, %4, %7 : vector<16x128xi32>
    %c0_i32_2 = arith.constant 0 : i32
    %9 = arith.cmpi slt, %2, %c0_i32_2 : i32
    %10 = vector.broadcast %9 : i1 to vector<16x128xi1>
    %11 = vector.broadcast %10 : vector<16x128xi1> to vector<16x128xi1>
    %12 = arith.xori %8, %11 : vector<16x128xi1>
    %13 = arith.andi %12, %6 : vector<16x128xi1>
    %14 = vector.broadcast %2 : i32 to vector<16x128xi32>
    %15 = arith.addi %4, %14 : vector<16x128xi32>
    %16 = arith.select %13, %15, %4 : vector<16x128xi1>, vector<16x128xi32>
    %c0_i32_3 = arith.constant 0 : i32
    %17 = vector.broadcast %c0_i32_3 : i32 to vector<16x128xi32>
    %18 = arith.cmpi ne, %16, %17 : vector<16x128xi32>
    %c16_i32_4 = arith.constant 16 : i32
    %c0_i32_5 = arith.constant 0 : i32
    %19 = arith.cmpi eq, %c16_i32_4, %c0_i32_5 : i32
    %c1_i32_6 = arith.constant 1 : i32
    %20 = arith.select %19, %c1_i32_6, %c16_i32_4 : i32
    %21 = vector.broadcast %20 : i32 to vector<16x128xi32>
    %22 = arith.remsi %0, %21 : vector<16x128xi32>
    %c0_i32_7 = arith.constant 0 : i32
    %23 = vector.broadcast %c0_i32_7 : i32 to vector<16x128xi32>
    %24 = arith.cmpi ne, %22, %23 : vector<16x128xi32>
    %c0_i32_8 = arith.constant 0 : i32
    %25 = vector.broadcast %c0_i32_8 : i32 to vector<16x128xi32>
    %26 = arith.cmpi slt, %22, %25 : vector<16x128xi32>
    %c0_i32_9 = arith.constant 0 : i32
    %27 = arith.cmpi slt, %20, %c0_i32_9 : i32
    %28 = vector.broadcast %27 : i1 to vector<16x128xi1>
    %29 = vector.broadcast %28 : vector<16x128xi1> to vector<16x128xi1>
    %30 = arith.xori %26, %29 : vector<16x128xi1>
    %31 = arith.andi %30, %24 : vector<16x128xi1>
    %32 = vector.broadcast %20 : i32 to vector<16x128xi32>
    %33 = arith.addi %22, %32 : vector<16x128xi32>
    %34 = arith.select %31, %33, %22 : vector<16x128xi1>, vector<16x128xi32>
    %c15_i32 = arith.constant 15 : i32
    %35 = vector.broadcast %c15_i32 : i32 to vector<16x128xi32>
    %36 = arith.cmpi ne, %34, %35 : vector<16x128xi32>
    %c0 = arith.constant 0 : index
    %c0_10 = arith.constant 0 : index
    %37 = vector.load %arg1[%c0, %c0_10] : memref<16x64xbf16, #tpu.memory_space<vmem>>, vector<16x64xbf16>
    %c0_11 = arith.constant 0 : index
    %c0_12 = arith.constant 0 : index
    %38 = vector.load %arg2[%c0_11, %c0_12] : memref<64x384xbf16, #tpu.memory_space<vmem>>, vector<64x384xbf16>
    %cst = arith.constant dense<0.000000e+00> : vector<16x384xf32>
    %39 = tpu.matmul %37, %38, %cst {dimension_numbers = #tpu.dot_dimension_numbers<[1], [0], [0], [1], [0, 0, 1, 1], [], []>} : vector<16x64xbf16>, vector<64x384xbf16>, vector<16x384xf32> -> vector<16x384xf32>
    %40 = vector.extract_strided_slice %39 {offsets = [0, 0], sizes = [16, 128], strides = [1, 1]} : vector<16x384xf32> to vector<16x128xf32>
    %41 = vector.extract_strided_slice %39 {offsets = [0, 128], sizes = [16, 128], strides = [1, 1]} : vector<16x384xf32> to vector<16x128xf32>
    %42 = vector.extract_strided_slice %39 {offsets = [0, 256], sizes = [16, 128], strides = [1, 1]} : vector<16x384xf32> to vector<16x128xf32>
    %c1_i32_13 = arith.constant 1 : i32
    %43 = tpu.dynamic_rotate %40 by %c1_i32_13 dim 0 : vector<16x128xf32>, i32 -> vector<16x128xf32>
    %cst_14 = arith.constant 0.000000e+00 : f32
    %44 = vector.broadcast %cst_14 : f32 to vector<16x128xf32>
    %45 = arith.select %18, %43, %44 : vector<16x128xi1>, vector<16x128xf32>
    %46 = arith.addf %41, %45 : vector<16x128xf32>
    %c15_i32_15 = arith.constant 15 : i32
    %47 = tpu.dynamic_rotate %42 by %c15_i32_15 dim 0 : vector<16x128xf32>, i32 -> vector<16x128xf32>
    %cst_16 = arith.constant 0.000000e+00 : f32
    %48 = vector.broadcast %cst_16 : f32 to vector<16x128xf32>
    %49 = arith.select %36, %47, %48 : vector<16x128xi1>, vector<16x128xf32>
    %50 = arith.addf %46, %49 : vector<16x128xf32>
    %c0_17 = arith.constant 0 : index
    %c0_18 = arith.constant 0 : index
    %51 = vector.load %arg3[%c0_17, %c0_18] : memref<1x128xf32, #tpu.memory_space<vmem>>, vector<1x128xf32>
    %52 = vector.broadcast %51 : vector<1x128xf32> to vector<16x128xf32>
    %53 = arith.addf %50, %52 : vector<16x128xf32>
    %cst_19 = arith.constant 0.000000e+00 : f32
    %54 = vector.broadcast %cst_19 : f32 to vector<16x128xf32>
    %55 = arith.maximumf %53, %54 : vector<16x128xf32>
    %56 = arith.truncf %55 : vector<16x128xf32> to vector<16x128xbf16>
    %c0_20 = arith.constant 0 : index
    %c0_21 = arith.constant 0 : index
    %57 = vector.load %arg4[%c0_20, %c0_21] : memref<128x384xbf16, #tpu.memory_space<vmem>>, vector<128x384xbf16>
    %cst_22 = arith.constant dense<0.000000e+00> : vector<16x384xf32>
    %58 = tpu.matmul %56, %57, %cst_22 {dimension_numbers = #tpu.dot_dimension_numbers<[1], [0], [0], [1], [0, 0, 1, 1], [], []>} : vector<16x128xbf16>, vector<128x384xbf16>, vector<16x384xf32> -> vector<16x384xf32>
    %59 = vector.extract_strided_slice %58 {offsets = [0, 0], sizes = [16, 128], strides = [1, 1]} : vector<16x384xf32> to vector<16x128xf32>
    %60 = vector.extract_strided_slice %58 {offsets = [0, 128], sizes = [16, 128], strides = [1, 1]} : vector<16x384xf32> to vector<16x128xf32>
    %61 = vector.extract_strided_slice %58 {offsets = [0, 256], sizes = [16, 128], strides = [1, 1]} : vector<16x384xf32> to vector<16x128xf32>
    %c1_i32_23 = arith.constant 1 : i32
    %62 = tpu.dynamic_rotate %59 by %c1_i32_23 dim 0 : vector<16x128xf32>, i32 -> vector<16x128xf32>
    %cst_24 = arith.constant 0.000000e+00 : f32
    %63 = vector.broadcast %cst_24 : f32 to vector<16x128xf32>
    %64 = arith.select %18, %62, %63 : vector<16x128xi1>, vector<16x128xf32>
    %65 = arith.addf %60, %64 : vector<16x128xf32>
    %c15_i32_25 = arith.constant 15 : i32
    %66 = tpu.dynamic_rotate %61 by %c15_i32_25 dim 0 : vector<16x128xf32>, i32 -> vector<16x128xf32>
    %cst_26 = arith.constant 0.000000e+00 : f32
    %67 = vector.broadcast %cst_26 : f32 to vector<16x128xf32>
    %68 = arith.select %36, %66, %67 : vector<16x128xi1>, vector<16x128xf32>
    %69 = arith.addf %65, %68 : vector<16x128xf32>
    %c0_27 = arith.constant 0 : index
    %c0_28 = arith.constant 0 : index
    %70 = vector.load %arg5[%c0_27, %c0_28] : memref<1x128xf32, #tpu.memory_space<vmem>>, vector<1x128xf32>
    %71 = vector.broadcast %70 : vector<1x128xf32> to vector<16x128xf32>
    %72 = arith.addf %69, %71 : vector<16x128xf32>
    %cst_29 = arith.constant 0.000000e+00 : f32
    %73 = vector.broadcast %cst_29 : f32 to vector<16x128xf32>
    %74 = arith.maximumf %72, %73 : vector<16x128xf32>
    %c0_30 = arith.constant 0 : index
    %c0_31 = arith.constant 0 : index
    %75 = vector.load %arg6[%c0_30, %c0_31] : memref<16x128xf32, #tpu.memory_space<vmem>>, vector<16x128xf32>
    tpu.vector_store %arg6[%c0_30, %c0_31], %74 {strides = array<i32>} : memref<16x128xf32, #tpu.memory_space<vmem>>, vector<16x128xf32>,
    return
  }
  func.func @transform_0(%arg0: i32) -> (i32, i32) {
    %c0_i32 = arith.constant 0 : i32
    %c0_i32_0 = arith.constant 0 : i32
    return %arg0, %c0_i32 : i32, i32
  }
  func.func @transform_1(%arg0: i32) -> (i32, i32) {
    %c0_i32 = arith.constant 0 : i32
    %c0_i32_0 = arith.constant 0 : i32
    %c0_i32_1 = arith.constant 0 : i32
    return %c0_i32, %c0_i32_0 : i32, i32
  }
  func.func @transform_2(%arg0: i32) -> (i32, i32) {
    %c0_i32 = arith.constant 0 : i32
    %c0_i32_0 = arith.constant 0 : i32
    %c0_i32_1 = arith.constant 0 : i32
    return %c0_i32, %c0_i32_0 : i32, i32
  }
  func.func @transform_3(%arg0: i32) -> (i32, i32) {
    %c0_i32 = arith.constant 0 : i32
    %c0_i32_0 = arith.constant 0 : i32
    %c0_i32_1 = arith.constant 0 : i32
    return %c0_i32, %c0_i32_0 : i32, i32
  }
  func.func @transform_4(%arg0: i32) -> (i32, i32) {
    %c0_i32 = arith.constant 0 : i32
    %c0_i32_0 = arith.constant 0 : i32
    %c0_i32_1 = arith.constant 0 : i32
    return %c0_i32, %c0_i32_0 : i32, i32
  }
  func.func @transform_5(%arg0: i32) -> (i32, i32) {
    %c0_i32 = arith.constant 0 : i32
    %c0_i32_0 = arith.constant 0 : i32
    return %arg0, %c0_i32 : i32, i32
  }
}

</mosaic_0001>

<bundles_post_ra>
// kernel: tpu_custom_call.1
= control target key start
LH: loop header
LB: loop body
LE: loop exit
PB: predicated region body
PF: predicated region fallthrough
CT: control target
= control target key end

     0   :  { %10 = vsyncpa [#allocation3], 0  ;;  %s1607_s0 = inlined_call_operand.hbm [shape: bf16[32,64], index: 0, kind: input, shape index: {}]   ;;  %s1608_s1 = inlined_call_operand.hbm [shape: bf16[64,384], index: 1, kind: input, shape index: {}]   ;;  %s1609_s2 = inlined_call_operand.vmem [shape: f32[1,128], index: 2, kind: input, shape index: {}]   ;;  %s1610_s3 = inlined_call_operand.hbm [shape: bf16[128,384], index: 3, kind: input, shape index: {}]   ;;  %s1611_s4 = inlined_call_operand.vmem [shape: f32[1,128], index: 4, kind: input, shape index: {}]   ;;  %s1612_s5 = inlined_call_operand.hbm [shape: f32[32,128], index: 5, kind: output, shape index: {}]  }
   0x1   :  { %12 = vsyncpa [#allocation3 + $0x1], 0 }
   0x2   :  { %13 = vsyncpa [#allocation6], 0 }
   0x3   :  { %14 = vsyncpa [#allocation4], 0 }
   0x4   :  { %16 = vsyncpa [#allocation4 + $0x1], 0  ;;  %s1323_s18 = smov 0   ;;  %s1325_s19 = smov 0  }
   0x5   :  { %s1327_s20 = smov 0   ;;  %s1329_s21 = smov 0  }
   0x6 LB: > { %s1344_s22 = sadd.s32 4294967295, %s1278_s21   ;;  %s890_s23 = sadd.s32 4294967294, %s1278_s21   ;;  %s1278_s21 = sphi %s1329_s21, %s1636_s21   ;;  %s1274_s20 = sphi %s1327_s20, %s1635_s20   ;;  %s1270_s19 = sphi %s1325_s19, %s1634_s19   ;;  %s1266_s18 = sphi %s1323_s18, %s1633_s18  }
   0x7   : > { %p42_p0 = scmp.ne.s32.totalorder %s1270_s19, %s1266_s18  ;;  %p1613_p1 = scmp.eq.s32.totalorder %s1344_s22, 0 }
   0x8   : > { %p156_p3 = scmp.eq.s32.totalorder %s890_s23, 1  ;;  %p891_p5 = scmp.ge.s32.totalorder %s1278_s21, 1 }
   0x9   : > { %p1353_p4 = por %p1613_p1, %p42_p0  ;;  %p163_p7 = scmp.lt.s32.totalorder %s1278_s21, 3 }
   0xa   : > { %p1358_p6 = por %p156_p3, %p42_p0  ;;  %s1280_s27 = smov [#allocation5]  }
   0xb   : > { %s1616_s24 = scalar_select %p1353_p4, 1, 0 }
   0xc   : > { %s1617_s25 = scalar_select %p1358_p6, 1, 0 }
   0xd   : > { %p1363_p8 = pnand %p891_p5, %p163_p7  ;;  %s175_s28 = sshll.u32 %s1280_s27, 4  ;;  %s1367_s28 = int_to_ptr.vmem [resolvable:$true] %s175_s28 }
   0xe   : > { %s1281_s30 = smov [#allocation7]   ;;  %s1122_s9 = scalar_lea.hbm %s1608_s1, 1536 }
   0xf   : > { %p1009_p9 = pneg %p1363_p8  ;;  %s191_s6 = sshll.u32 %s1281_s30, 4  ;;  %s1378_s6 = int_to_ptr.vmem [resolvable:$true] %s191_s6 }
  0x10   : > { %p1123_p12 = scmp.ne.s32.totalorder %s1608_s1, %s1122_s9  ;;  %p1129_p5 = scmp.lt.u32.totalorder %s1122_s9, %s1608_s1 }
  0x11   : > { %p1374_p11 = pnand %p1009_p9, %p1613_p1 }
  0x13   : > { %p1124_p13 = pneg %p1374_p11 }
  0x15   : > { %p1125_p0 = pnand %p1124_p13, %p1123_p12 }
  0x17   : > { %p1126_p3 = pneg %p1125_p0 }
  0x19   : > { %p1131_p7 = pnand %p1129_p5, %p1126_p3 }
  0x1b   : > { %1134 = shalt.err (!%p1131_p7)
}
  0x1c   : > { %s1135_s14 = scalar_lea.vmem %s1367_s28, 1536  ;;  %p1143_p2 = scmp.lt.s32.totalorder %s1367_s28, %s1367_s28 }
  0x1d   : > { %p1136_p9 = scmp.ne.s32.totalorder %s1367_s28, %s1135_s14  ;;  %p1144_p12 = scmp.lt.s32.totalorder %s1135_s14, %s1135_s14 }
  0x1f   : > { %p1138_p10 = pnand %p1136_p9, %p1124_p13  ;;  %p1145_p0 = por %p1144_p12, %p1143_p2 }
  0x21   : > { %p1139_p1 = pneg %p1138_p10 }
  0x23   : > { %p1146_p6 = pnand %p1145_p0, %p1139_p1 }
  0x25   : > { %1149 = shalt.err (!%p1146_p6)
}
  0x26   : > { %s1282_s15 = smov 192   ;;  %s1283_s16 = smov 12  }
  0x27   : > { %1012 = dma.hbm_to_vmem [thread:$0]  (!%p1374_p11), %s1608_s1, 1536, %s1367_s28, [#allocation6], %s1282_s15, %s1282_s15, %s1283_s16  }
  0x28   : > { %s1150_s7 = scalar_lea.hbm %s1610_s3, 3072 }
  0x29   : > { %p1151_p2 = scmp.ne.s32.totalorder %s1610_s3, %s1150_s7  ;;  %p1157_p10 = scmp.lt.u32.totalorder %s1150_s7, %s1610_s3 }
  0x2b   : > { %p1153_p1 = pnand %p1151_p2, %p1124_p13 }
  0x2d   : > { %p1154_p6 = pneg %p1153_p1 }
  0x2f   : > { %p1159_p3 = pnand %p1157_p10, %p1154_p6 }
  0x31   : > { %1162 = shalt.err (!%p1159_p3)
}
  0x32   : > { %s1163_s28 = scalar_lea.vmem %s1378_s6, 3072  ;;  %p1171_p12 = scmp.lt.s32.totalorder %s1378_s6, %s1378_s6 }
  0x33   : > { %p1164_p5 = scmp.ne.s32.totalorder %s1378_s6, %s1163_s28  ;;  %p1172_p0 = scmp.lt.s32.totalorder %s1163_s28, %s1163_s28 }
  0x35   : > { %p1166_p7 = pnand %p1164_p5, %p1124_p13  ;;  %p1173_p2 = por %p1172_p0, %p1171_p12 }
  0x37   : > { %p1167_p9 = pneg %p1166_p7 }
  0x39   : > { %p1174_p1 = pnand %p1173_p2, %p1167_p9 }
  0x3b   : > { %1177 = shalt.err (!%p1174_p1)
}
  0x3c   : > { %1015 = dma.hbm_to_vmem [thread:$0]  (!%p1374_p11), %s1610_s3, 3072, %s1378_s6, [#allocation6], %s1282_s15, %s1282_s15, %s1283_s16  }
  0x3d   : > { %s1433_s14 = sadd.s32 1, %s1278_s21   ;;  %s29_s29 = sadd.s32 1, %s1274_s20 }
  0x3e   : > { %s26_s17 = ssub.s32 %s1278_s21, %s1433_s14  ;;  %p36_p13 = scmp.ne.s32.totalorder %s1274_s20, %s1270_s19 }
  0x3f   : > { %p27_p6 = scmp.eq.s32.totalorder %s26_s17, 0  ;;  %p37_p10 = scmp.eq.s32.totalorder %s1278_s21, 0 }
  0x40   : > { %p1620_p3 = scmp.eq.s32.totalorder %s1344_s22, 1  ;;  %p1026_p7 = scmp.lt.s32.totalorder %s1278_s21, 2 }
  0x41   : > { %s1449_s27 = scalar_select %p27_p6, %s1274_s20, %s29_s29  }
  0x42   : > { %p1443_p5 = por %p1620_p3, %p36_p13  ;;  %p38_p9 = por %p37_p10, %p36_p13 }
  0x43   : > { %s208_s30 = sand.u32 1, %s1274_s20   ;;  %s949_s6 = sshll.u32 %s1278_s21, 7 }
  0x44   : > { %s1621_s23 = scalar_select %p1443_p5, 1, 0 }
  0x45   : > { %s895_s7 = sshll.u32 %s208_s30, 3  ;;  %s1456_s8 = scalar_lea.hbm %s1607_s0, %s949_s6 }
  0x46   : > { %s212_s9 = scalar_lea.vmem [#allocation2], %s895_s7  ;;  %p1460_p11 = pnand %p1026_p7, %p38_p9 }
  0x47   : > { %s219_s10 = sshll.u32 %s212_s9, 4  ;;  %s1464_s28 = scalar_lea.sflag [#allocation3], %s208_s30  ;;  %s1458_s10 = int_to_ptr.vmem [resolvable:$true] %s219_s10 }
  0x48   : > { %s1178_s12 = scalar_lea.hbm %s1456_s8, 128  ;;  %p1180_p0 = pneg %p1460_p11 }
  0x49   : > { %p1179_p12 = scmp.ne.s32.totalorder %s1456_s8, %s1178_s12  ;;  %s1183_s17 = scalar_lea.hbm %s1607_s0, 256 }
  0x4a   : > { %p1184_p13 = scmp.lt.u32.totalorder %s1456_s8, %s1607_s0  ;;  %p1185_p6 = scmp.lt.u32.totalorder %s1183_s17, %s1178_s12 }
  0x4b   : > { %p1181_p2 = pnand %p1180_p0, %p1179_p12  ;;  %p1187_p3 = scmp.lt.u32.totalorder %s1178_s12, %s1456_s8 }
  0x4c   : > { %p1186_p10 = por %p1185_p6, %p1184_p13 }
  0x4d   : > { %p1182_p1 = pneg %p1181_p2 }
  0x4e   : > { %p1188_p7 = por %p1187_p3, %p1186_p10 }
  0x50   : > { %p1189_p9 = pnand %p1188_p7, %p1182_p1 }
  0x52   : > { %1192 = shalt.err (!%p1189_p9)
}
  0x53   : > { %s1193_s30 = scalar_lea.vmem %s1458_s10, 128  ;;  %s1284_s15 = smov [#allocation2]  }
  0x54   : > { %p1194_p12 = scmp.ne.s32.totalorder %s1458_s10, %s1193_s30  ;;  %s1198_s16 = sshll.u32 %s1284_s15, 4  ;;  %s1199_s16 = int_to_ptr.vmem [resolvable:$false] %s1198_s16 }
  0x55   : > { %s1200_s9 = scalar_lea.vmem %s1199_s16, 256  ;;  %p1201_p4 = scmp.lt.s32.totalorder %s1458_s10, %s1199_s16 }
  0x56   : > { %p1196_p2 = pnand %p1194_p12, %p1180_p0  ;;  %p1202_p13 = scmp.lt.s32.totalorder %s1200_s9, %s1193_s30 }
  0x58   : > { %p1197_p5 = pneg %p1196_p2  ;;  %p1203_p6 = por %p1202_p13, %p1201_p4 }
  0x5a   : > { %p1204_p10 = pnand %p1203_p6, %p1197_p5 }
  0x5c   : > { %1207 = shalt.err (!%p1204_p10)
}
  0x5d   : > { %s1285_s12 = smov 64   ;;  %s1286_s13 = smov 4  }
  0x5e   : > { %1019 = dma.hbm_to_vmem [thread:$0]  (!%p1460_p11), %s1456_s8, 128, %s1458_s10, %s1464_s28, %s1285_s12, %s1285_s12, %s1286_s13  }
  0x5f   : > { %231 = sbr.rel (%p1363_p8) target bundleno = 593 (0x251), region = 40  ;;  %s1495_s29 = sand.u32 (!%p1363_p8), 1, %s1270_s19  }
  0x60   : > { %s899_s17 = sshll.u32 (!%p1363_p8), %s1495_s29, 3  ;;  %s234_s7 = scalar_lea.sflag (!%p1363_p8), [#allocation3], %s1495_s29 }
  0x61   : > { %s1499_s6 = scalar_lea.vmem (!%p1363_p8), [#allocation2], %s899_s17  ;;  %p1623_p4 = scmp.ne.s32.totalorder (!%p1363_p8), %s1616_s24, 0 }
  0x66   : > { %1253 = dma.done.wait (%p1623_p4), %s234_s7, 128  }
  0x67   : > { %1255 = vsyncadd (%p1623_p4), %s234_s7, 4294967168  ;;  %p1624_p5 = scmp.eq.s32.totalorder %s1344_s22, 0 }
  0x69   : > { %1257 = dma.done.wait (%p1624_p5), [#allocation6], 4608   ;;  %p1625_p8 = pmov %p1624_p5 }
  0x6a   : > { %v1287_v0 = vmov 0.0   ;;  %vm1288_vm0 = vmmov 0   ;;  %v1289_v1 = vmov 0   ;;  %v1073_v2 = vld [vmem:[#allocation5 + $0x4] ss:$12 sps:$4 sm:$0xff]   ;;  %vm393_vm1 = vcmask 523264  }
  0x6b   : > { %1259 = vsyncadd (%p1625_p8), [#allocation6], 4294962688  ;;  %965 = vmatprep.subr.bf16.mxu1 %v1287_v0  ;;  %973 = vmatprep.mubr.msk.bf16.mxu1 %vm1288_vm0, %v1287_v0  ;;  %v1075_v3 = vld [vmem:[#allocation5 + $0x8] ss:$12 sps:$4 sm:$0xff]   ;;  %v1076_v4 = vld [vmem:[#allocation5] ss:$12 sps:$4 sm:$0xff]   ;;  %v275_v39 = vlaneseq }
  0x6c   : > { %429 = vmatprep.mubr.bf16.mxu0 %v1289_v1  ;;  %397 = vmatprep.subr.bf16.mxu0 %v1073_v2  ;;  %v1077_v5 = vld [vmem:[#allocation5 + $0x1c] ss:$12 sps:$4 sm:$0xff]   ;;  %v1079_v6 = vld [vmem:[#allocation5 + $0x20] ss:$12 sps:$4 sm:$0xff]   ;;  %v1080_v7 = vld [vmem:[#allocation5 + $0x18] ss:$12 sps:$4 sm:$0xff]  }
  0x6d   : > { %966 = vmatpush3.bf16.msra.mxu1 %v1075_v3  ;;  %398 = vmatpush1.bf16.msra.mxu0 %v1076_v4  ;;  %v1081_v8 = vld [vmem:[#allocation5 + $0x34] ss:$12 sps:$4 sm:$0xff]   ;;  %v1083_v9 = vld [vmem:[#allocation5 + $0x38] ss:$12 sps:$4 sm:$0xff]   ;;  %v1084_v10 = vld [vmem:[#allocation5 + $0x30] ss:$12 sps:$4 sm:$0xff]  }
  0x6e   : > { %967 = vmatprep.subr.bf16.mxu1 %v1287_v0  ;;  %399 = vmatprep.subr.bf16.mxu0 %v1077_v5  ;;  %v1085_v11 = vld [vmem:[#allocation5 + $0x4c] ss:$12 sps:$4 sm:$0xff]   ;;  %v1087_v12 = vld [vmem:[#allocation5 + $0x50] ss:$12 sps:$4 sm:$0xff]   ;;  %v1088_v13 = vld [vmem:[#allocation5 + $0x48] ss:$12 sps:$4 sm:$0xff]  }
  0x6f   : > { %v1092_v14 = vld [vmem:[#allocation7 + $0x4] ss:$12 sps:$4 sm:$0xff]   ;;  %v1093_v16 = vld [vmem:[#allocation7 + $0x8] ss:$12 sps:$4 sm:$0xff]   ;;  %v1090_v17 = vld [vmem:[#allocation7] ss:$12 sps:$4 sm:$0xff]  }
  0x70   : > { %v1089_v15 = vld [vmem:[%s1499_s6] sm:$0xff]   ;;  %v1097_v20 = vld [vmem:[#allocation7 + $0x20] ss:$12 sps:$4 sm:$0xff]   ;;  %v276_v40 = vshrl.u32 %v275_v39, 7  ;;  %s902_s8 = sshll.u32 %s1495_s29, 4  ;;  %s950_s15 = sshll.u32 %s1344_s22, 8 }
  0x71   : > { %968 = vmatpush3.bf16.msra.mxu1 %v1079_v6  ;;  %400 = vmatpush1.bf16.msra.mxu0 %v1080_v7  ;;  %v1096_v18 = vld [vmem:[#allocation7 + $0x1c] ss:$12 sps:$4 sm:$0xff]   ;;  %v1094_v19 = vld [vmem:[#allocation7 + $0x18] ss:$12 sps:$4 sm:$0xff]   ;;  %v1100_v21 = vld [vmem:[#allocation7 + $0x34] ss:$12 sps:$4 sm:$0xff]   ;;  %s1563_s12 = scalar_lea.hbm %s1612_s5, %s950_s15 }
  0x72   : > { %969 = vmatprep.subr.bf16.mxu1 %v1287_v0  ;;  %401 = vmatprep.subr.bf16.mxu0 %v1081_v8  ;;  %v1101_v22 = vld [vmem:[#allocation7 + $0x38] ss:$12 sps:$4 sm:$0xff]   ;;  %v1098_v23 = vld [vmem:[#allocation7 + $0x30] ss:$12 sps:$4 sm:$0xff]   ;;  %v1102_v26 = vld [vmem:[#allocation7 + $0x48] ss:$12 sps:$4 sm:$0xff]  }
  0x73   : > { %v1104_v24 = vld [vmem:[#allocation7 + $0x4c] ss:$12 sps:$4 sm:$0xff]   ;;  %v1105_v25 = vld [vmem:[#allocation7 + $0x50] ss:$12 sps:$4 sm:$0xff]   ;;  %v1109_v29 = vld [vmem:[#allocation7 + $0x68] ss:$12 sps:$4 sm:$0xff]  }
  0x74   : > { %v1108_v27 = vld [vmem:[#allocation7 + $0x64] ss:$12 sps:$4 sm:$0xff]   ;;  %v1106_v28 = vld [vmem:[#allocation7 + $0x60] ss:$12 sps:$4 sm:$0xff]   ;;  %v1112_v30 = vld [vmem:[#allocation7 + $0x7c] ss:$12 sps:$4 sm:$0xff]  }
  0x75   : > { %970 = vmatpush3.bf16.msra.mxu1 %v1083_v9  ;;  %402 = vmatpush1.bf16.msra.mxu0 %v1084_v10  ;;  %v1110_v31 = vld [vmem:[#allocation7 + $0x78] ss:$12 sps:$4 sm:$0xff]   ;;  %v1113_v32 = vld [vmem:[#allocation7 + $0x80] ss:$12 sps:$4 sm:$0xff]   ;;  %v1114_v34 = vld [vmem:[#allocation7 + $0x90] ss:$12 sps:$4 sm:$0xff]  }
  0x76   : > { %971 = vmatprep.subr.bf16.mxu1 %v1287_v0  ;;  %403 = vmatprep.subr.bf16.mxu0 %v1085_v11  ;;  %v1116_v33 = vld [vmem:[#allocation7 + $0x94] ss:$12 sps:$4 sm:$0xff]   ;;  %v1117_v35 = vld [vmem:[#allocation7 + $0x98] ss:$12 sps:$4 sm:$0xff]   ;;  %v1121_v38 = vld [vmem:[#allocation7 + $0xb0] ss:$12 sps:$4 sm:$0xff]  }
  0x77   : > { %v1120_v36 = vld [vmem:[#allocation7 + $0xac] ss:$12 sps:$4 sm:$0xff]   ;;  %v1118_v37 = vld [vmem:[#allocation7 + $0xa8] ss:$12 sps:$4 sm:$0xff]   ;;  %v277_v41 = vadd.s32 8, %v276_v40  ;;  %v282_v44 = vand.u32 15, %v276_v40 }
  0x78   : > { %vm492_vm2 = vcmp.lt.s32.totalorder %v276_v40, 7  ;;  %vm483_vm3 = vcmp.lt.s32.totalorder %v276_v40, 1  ;;  %v918_v2 = vld [vmem:[%s1609_s2] ss:$0 sm:$0xff]  ;;  %s271_s28 = scalar_lea.vmem [#allocation8], %s902_s8  ;;  %s785_s13 = scalar_lea.sflag [#allocation4], %s1495_s29 }
  0x79   : > { %972 = vmatpush3.bf16.msra.mxu1 %v1087_v12  ;;  %404 = vmatpush1.bf16.msra.mxu0 %v1088_v13  ;;  %v289_v42 = vand.u32 15, %v277_v41  ;;  %vm1530_vm5 = vcmp.ne.s32.totalorder %v282_v44, 0  ;;  %s798_s30 = sshll.u32 %s271_s28, 4  ;;  %p1630_p0 = scmp.ne.s32.totalorder %s1621_s23, 0  ;;  %s1558_s30 = int_to_ptr.vmem [resolvable:$true] %s798_s30 }
  0x7a   : > { %977 = vmatprep.subr.bf16.mxu1 %v1287_v0  ;;  %671 = vmatprep.subr.bf16.mxu0 %v1092_v14  ;;  %s1208_s17 = scalar_lea.vmem %s1558_s30, 256  ;;  %s1290_s22 = smov [#allocation8]  }
  0x7b   : > { %vm1526_vm4 = vcmp.ne.s32.totalorder %v289_v42, 15  ;;  %p1209_p11 = scmp.ne.s32.totalorder %s1558_s30, %s1208_s17  ;;  %s1212_s7 = sshll.u32 %s1290_s22, 4  ;;  %s1213_s7 = int_to_ptr.vmem [resolvable:$false] %s1212_s7 }
  0x7c   : > { %974 = vmatmul.mubr.msk.bf16.vlgmr.msra.gmra.mrb[0].mxu1 %vm393_vm1, %v1089_v15  ;;  %916 = vmatmul.mubr.msk.bf16.vlgmr.msra.gmra.mrb[0].mxu0 %vm393_vm1, %v1089_v15  ;;  %s1214_s6 = scalar_lea.vmem %s1213_s7, 512  ;;  %p1215_p7 = scmp.lt.s32.totalorder %s1558_s30, %s1213_s7 }
  0x7d   : > { %978 = vmatpush3.bf16.msra.mxu1 %v1093_v16  ;;  %672 = vmatpush1.bf16.msra.mxu0 %v1090_v17  ;;  %p1210_p1 = pnand %p1209_p11, %p1630_p0  ;;  %p1216_p9 = scmp.lt.s32.totalorder %s1214_s6, %s1208_s17 }
  0x7e   : > { %979 = vmatprep.subr.bf16.mxu1 %v1287_v0  ;;  %673 = vmatprep.subr.bf16.mxu0 %v1096_v18 }
  0x7f   : > { %703 = vmatprep.mubr.bf16.mxu0 %v1289_v1  ;;  %993 = vmatprep.mubr.msk.bf16.mxu1 %vm1288_vm0, %v1287_v0  ;;  %p1211_p3 = pneg %p1210_p1  ;;  %p1217_p12 = por %p1216_p9, %p1215_p7 }
  0x81   : > { %980 = vmatpush3.bf16.msra.mxu1 %v1097_v20  ;;  %674 = vmatpush1.bf16.msra.mxu0 %v1094_v19  ;;  %p1218_p2 = pnand %p1217_p12, %p1211_p3 }
  0x82   : > { %981 = vmatprep.subr.bf16.mxu1 %v1287_v0  ;;  %675 = vmatprep.subr.bf16.mxu0 %v1100_v21 }
  0x85   : > { %982 = vmatpush3.bf16.msra.mxu1 %v1101_v22  ;;  %676 = vmatpush1.bf16.msra.mxu0 %v1098_v23 }
  0x86   : > { %983 = vmatprep.subr.bf16.mxu1 %v1287_v0  ;;  %677 = vmatprep.subr.bf16.mxu0 %v1104_v24 }
  0x89   : > { %984 = vmatpush3.bf16.msra.mxu1 %v1105_v25  ;;  %678 = vmatpush1.bf16.msra.mxu0 %v1102_v26 }
  0x8a   : > { %985 = vmatprep.subr.bf16.mxu1 %v1287_v0  ;;  %679 = vmatprep.subr.bf16.mxu0 %v1108_v27 }
  0x8d   : > { %680 = vmatpush1.bf16.msra.mxu0 %v1106_v28  ;;  %986 = vmatpush3.bf16.msra.mxu1 %v1109_v29 }
  0x8e   : > { %987 = vmatprep.subr.bf16.mxu1 %v1287_v0  ;;  %681 = vmatprep.subr.bf16.mxu0 %v1112_v30  ;;  %v943_v30 = vld [vmem:[%s1611_s4] ss:$0 sm:$0xff] }
  0x91   : > { %682 = vmatpush1.bf16.msra.mxu0 %v1110_v31  ;;  %988 = vmatpush3.bf16.msra.mxu1 %v1113_v32 }
  0x92   : > { %989 = vmatprep.subr.bf16.mxu1 %v1287_v0  ;;  %683 = vmatprep.subr.bf16.mxu0 %v1116_v33 }
  0x95   : > { %684 = vmatpush1.bf16.msra.mxu0 %v1114_v34  ;;  %990 = vmatpush3.bf16.msra.mxu1 %v1117_v35 }
  0x96   : > { %991 = vmatprep.subr.bf16.mxu1 %v1287_v0  ;;  %685 = vmatprep.subr.bf16.mxu0 %v1120_v36 }
  0x99   : > { %686 = vmatpush1.bf16.msra.mxu0 %v1118_v37  ;;  %992 = vmatpush3.bf16.msra.mxu1 %v1121_v38 }
 0x14f   : > { %v474_v43 = vpop.f32.mrb[0].mxu1  ;;  %v431_v46 = vpop.f32.mrb[0].mxu0 }
 0x150   : > { %v490_v45 = vrot.slane %v474_v43, 1  ;;  %v975_v47 = vpop.f32.mrb[1].mxu1  ;;  %v433_v48 = vpop.f32.mrb[1].mxu0  ;;  %v481_v54 = vrot.slane %v431_v46, 7 }
 0x151   : > { %v477_v49 = vpop.f32.mrb[2].mxu1  ;;  %v435_v51 = vpop.f32.mrb[2].mxu0 }
 0x152   : > { %v491_v50 = vrot.slane %v477_v49, 1  ;;  %v976_v52 = vpop.f32.mrb[3].mxu1  ;;  %v482_v56 = vrot.slane %v435_v51, 7  ;;  %v437_v57 = vpop.f32.mrb[3].mxu0 }
 0x154   : > { %v493_v58 = vsel %vm492_vm2, %v490_v45, %v491_v50  ;;  %v494_v59 = vsel %vm492_vm2, %v491_v50, %v490_v45  ;;  %v485_v60 = vsel %vm483_vm3, %v482_v56, %v481_v54  ;;  %v484_v61 = vsel %vm483_vm3, %v481_v54, %v482_v56 }
 0x155   : > { %v496_v62 = vsel %vm1526_vm4, %v494_v59, 0.0  ;;  %v486_v63 = vsel %vm1530_vm5, %v485_v60, 0.0  ;;  %v489_v0 = vadd.f32 %v484_v61, %v437_v57 }
 0x156   : > { %v488_v1 = vadd.f32 %v486_v63, %v433_v48 }
 0x157   : > { %v498_v3 = vadd.f32 %v496_v62, %v489_v0 }
 0x158   : > { %v497_v4 = vadd.f32 %v493_v58, %v488_v1 }
 0x159   : > { %v507_v5 = vadd.f32 %v918_v2, %v498_v3 }
 0x15a   : > { %v506_v6 = vadd.f32 %v918_v2, %v497_v4 }
 0x15b   : > { %v509_v7 = vmax.f32 %v507_v5, 0.0 }
 0x15c   : > { %v508_v8 = vmax.f32 %v506_v6, 0.0 }
 0x15e   : > { %v510_v9 = vpack.c.bf16 %v509_v7, %v508_v8 }
 0x160   : > { %704 = vmatmul.mubr.bf16.vlgmr.msra.gmra.mrb[4].mxu0 %v510_v9  ;;  %994 = vmatmul.mubr.bf16.vlgmr.msra.gmra.mrb[4].mxu1 %v510_v9 }
 0x233   : > { %v705_v10 = vpop.f32.mrb[4].mxu0  ;;  %v748_v11 = vpop.f32.mrb[4].mxu1 }
 0x234   : > { %v707_v12 = vpop.f32.mrb[5].mxu0  ;;  %v995_v13 = vpop.f32.mrb[5].mxu1  ;;  %v755_v16 = vrot.slane %v705_v10, 7  ;;  %v763_v17 = vrot.slane %v748_v11, 1 }
 0x235   : > { %v709_v14 = vpop.f32.mrb[6].mxu0  ;;  %v751_v15 = vpop.f32.mrb[6].mxu1 }
 0x236   : > { %v756_v18 = vrot.slane %v709_v14, 7  ;;  %v764_v19 = vrot.slane %v751_v15, 1  ;;  %v711_v20 = vpop.f32.mrb[7].mxu0  ;;  %v996_v21 = vpop.f32.mrb[7].mxu1 }
 0x238   : > { %v758_v22 = vsel %vm483_vm3, %v756_v18, %v755_v16  ;;  %v765_v23 = vsel %vm492_vm2, %v763_v17, %v764_v19  ;;  %v757_v24 = vsel %vm483_vm3, %v755_v16, %v756_v18  ;;  %v766_v25 = vsel %vm492_vm2, %v764_v19, %v763_v17 }
 0x239   : > { %v759_v26 = vsel %vm1530_vm5, %v758_v22, 0.0  ;;  %v762_v27 = vadd.f32 %v757_v24, %v711_v20  ;;  %v768_v28 = vsel %vm1526_vm4, %v766_v25, 0.0 }
 0x23a   : > { %v761_v29 = vadd.f32 %v759_v26, %v707_v12 }
 0x23b   : > { %v770_v31 = vadd.f32 %v768_v28, %v762_v27 }
 0x23c   : > { %v769_v32 = vadd.f32 %v765_v23, %v761_v29 }
 0x23d   : > { %v779_v33 = vadd.f32 %v943_v30, %v770_v31 }
 0x23e   : > { %v778_v34 = vadd.f32 %v943_v30, %v769_v32 }
 0x23f   : > { %v781_v35 = vmax.f32 %v779_v33, 0.0 }
 0x240   : > { %v780_v36 = vmax.f32 %v778_v34, 0.0 }
 0x241   : > { %783 = vst [vmem:[%s271_s28 + $0x8] sm:$0xff] %v781_v35 }
 0x242   : > { %782 = vst [vmem:[%s271_s28] sm:$0xff] %v780_v36 }
 0x243   : > { %1221 = shalt.err (!%p1218_p2)
}
 0x244   : > { %s1222_s24 = scalar_lea.hbm %s1563_s12, 256  ;;  %s1226_s10 = scalar_lea.hbm %s1612_s5, 512 }
 0x245   : > { %p1223_p13 = scmp.ne.s32.totalorder %s1563_s12, %s1222_s24  ;;  %p1227_p4 = scmp.lt.u32.totalorder %s1563_s12, %s1612_s5 }
 0x246   : > { %p1228_p5 = scmp.lt.u32.totalorder %s1226_s10, %s1222_s24  ;;  %p1230_p11 = scmp.lt.u32.totalorder %s1222_s24, %s1563_s12 }
 0x247   : > { %p1224_p6 = pnand %p1223_p13, %p1630_p0 }
 0x248   : > { %p1229_p8 = por %p1228_p5, %p1227_p4 }
 0x249   : > { %p1225_p10 = pneg %p1224_p6 }
 0x24a   : > { %p1231_p1 = por %p1230_p11, %p1229_p8 }
 0x24c   : > { %p1232_p3 = pnand %p1231_p1, %p1225_p10 }
 0x24e   : > { %1235 = shalt.err (!%p1232_p3)
}
 0x24f   : > { %s1291_s15 = smov 128   ;;  %s1292_s16 = smov 8  }
 0x250   : > { %1007 = dma.vmem_to_hbm [thread:$0]  (%p1630_p0), %s1558_s30, 256, %s1563_s12, %s785_s13, %s1291_s15, %s1291_s15, %s1292_s16  }
 0x251 PF: > { %s813_s9 = sand.u32 1, %s1266_s18   ;;  %p1631_p7 = scmp.ne.s32.totalorder %s1617_s25, 0 }
 0x252   : > { %p1632_p9 = scmp.ge.s32.totalorder %s1278_s21, 2  ;;  %s814_s17 = scalar_lea.sflag [#allocation4], %s813_s9 }
 0x254   : > { %p1021_p12 = pnand %p1632_p9, %p1631_p7 }
 0x256   : > { %1261 = dma.done.wait (!%p1021_p12), %s814_s17, 256  }
 0x257   : > { %1263 = vsyncadd (!%p1021_p12), %s814_s17, 4294967040  ;;  %p19_p2 = scmp.ge.s32.totalorder %s1433_s14, 4   ;;  %s1633_s18 = smov %s1270_s19 }
 0x258   : > { %s1634_s19 = smov %s1274_s20  ;;  %s1635_s20 = smov %s1449_s27 }
 0x259   : > { %s1636_s21 = smov %s1433_s14  ;;  %21 = sbr.rel (!%p19_p2) target bundleno = 6 (0x6), region = 93 }
 0x260   :  { %819 = vsyncpa [#allocation3], 1 }
 0x261   :  { %821 = vsyncpa [#allocation3 + $0x1], 1 }
 0x262   :  { %822 = vsyncpa [#allocation6], 1 }
 0x263   :  { %823 = vsyncpa [#allocation4], 1 }
 0x264   :  { %825 = vsyncpa [#allocation4 + $0x1], 1 }

</bundles_post_ra>
